<compile_context>
chip_gen: v6e
topology: v6e:2x2x1
jax: 0.10.0
libtpu: 0.0.40
codegen_flags: <defaults>
</compile_context>

<pallas_src>
import jax
import jax.numpy as jnp
from jax import lax
from jax.experimental import pallas as pl
from jax.experimental.pallas import tpu as pltpu


def _round_up(x, m):
    return (x + m - 1) // m * m


# ----------------------------------------------------------------------------
# Tiled matmul kernel (bf16 MXU path, f32 accumulation)
# ----------------------------------------------------------------------------
def _matmul_kernel(a_ref, b_ref, o_ref, acc_ref):
    @pl.when(pl.program_id(2) == 0)
    def _():
        acc_ref[...] = jnp.zeros_like(acc_ref)

    acc_ref[...] += jnp.dot(a_ref[...], b_ref[...],
                            preferred_element_type=jnp.float32)

    @pl.when(pl.program_id(2) == pl.num_programs(2) - 1)
    def _():
        o_ref[...] = acc_ref[...].astype(o_ref.dtype)


def pallas_matmul(a, b, *, tm=256, tn=256, tk=512):
    """(M, K) @ (K, N) -> (M, N) f32.  Operands cast to bf16 (f32 accumulate),
    padded to tile multiples, pipelined over a (M/tm, N/tn, K/tk) grid."""
    M, K = a.shape
    K2, N = b.shape
    assert K == K2
    a = a.astype(jnp.bfloat16)
    b = b.astype(jnp.bfloat16)

    Mp = _round_up(M, 8)
    Kp = _round_up(K, 128)
    Np = _round_up(N, 128)
    tm = min(tm, Mp)
    tk = min(tk, Kp)
    tn = min(tn, Np)
    Mp = _round_up(Mp, tm)
    Kp = _round_up(Kp, tk)
    Np = _round_up(Np, tn)
    if (Mp, Kp) != (M, K):
        a = jnp.pad(a, ((0, Mp - M), (0, Kp - K)))
    if (Kp, Np) != (K, N):
        b = jnp.pad(b, ((0, Kp - K), (0, Np - N)))

    grid = (Mp // tm, Np // tn, Kp // tk)
    out = pl.pallas_call(
        _matmul_kernel,
        out_shape=jax.ShapeDtypeStruct((Mp, Np), jnp.float32),
        grid_spec=pltpu.PrefetchScalarGridSpec(
            num_scalar_prefetch=0,
            grid=grid,
            in_specs=[pl.BlockSpec((tm, tk), lambda i, j, k: (i, k)),
                      pl.BlockSpec((tk, tn), lambda i, j, k: (k, j))],
            out_specs=pl.BlockSpec((tm, tn), lambda i, j, k: (i, j)),
            scratch_shapes=[pltpu.VMEM((tm, tn), jnp.float32)],
        ),
        compiler_params=pltpu.CompilerParams(
            dimension_semantics=("parallel", "parallel", "arbitrary"),
            vmem_limit_bytes=48 * 1024 * 1024,
        ),
        cost_estimate=pl.CostEstimate(
            flops=2 * Mp * Np * Kp,
            transcendentals=0,
            bytes_accessed=Mp * Kp * 2 + Kp * Np * 2 + Mp * Np * 4),
    )(a, b)
    return out[:M, :N]


# ----------------------------------------------------------------------------
# Similarity kernel: logits = x (B, K) @ w (C, K)^T on the MXU, lane-dense output
# ----------------------------------------------------------------------------
def _sim_kernel(x_ref, w_ref, o_ref):
    o_ref[...] = lax.dot_general(
        x_ref[...], w_ref[...],
        dimension_numbers=(((1,), (1,)), ((), ())),
        preferred_element_type=jnp.float32)


def similarity_matmul_pallas(x, w_pad, num_classes):
    """x: (B, K); w_pad: (Cp, Kp) bf16 padded once at init.  Returns (B, num_classes)."""
    B, K = x.shape
    Cp, Kp = w_pad.shape
    Bp = _round_up(B, 8)
    x = jnp.pad(x.astype(jnp.bfloat16), ((0, Bp - B), (0, Kp - K)))
    out = pl.pallas_call(
        _sim_kernel,
        out_shape=jax.ShapeDtypeStruct((Bp, Cp), jnp.float32),
        grid=(1,),
        in_specs=[pl.BlockSpec((Bp, Kp), lambda i: (0, 0)),
                  pl.BlockSpec((Cp, Kp), lambda i: (0, 0))],
        out_specs=pl.BlockSpec((Bp, Cp), lambda i: (0, 0)),
        compiler_params=pltpu.CompilerParams(
            vmem_limit_bytes=48 * 1024 * 1024),
        cost_estimate=pl.CostEstimate(
            flops=2 * Bp * Cp * Kp,
            transcendentals=0,
            bytes_accessed=Bp * Kp * 2 + Cp * Kp * 2 + Bp * Cp * 4),
    )(x, w_pad)
    return out[:B, :num_classes]


# ----------------------------------------------------------------------------
# Synthetic MLM encoder (stand-in for the external pretrained `self.mlm`)
# ----------------------------------------------------------------------------
# TODO(synk): the real module wraps a pretrained HuggingFace MLM (e.g. BERT); it is
# replaced here by a deterministic single-layer transformer encoder.
def layernorm(x, g, b, eps=1e-12):
    mu = jnp.mean(x, axis=-1, keepdims=True)
    var = jnp.mean(jnp.square(x - mu), axis=-1, keepdims=True)
    return (x - mu) / jnp.sqrt(var + eps) * g + b


def synthetic_mlm(params, inputs_embeds, attention_mask, token_type_ids):
    B, S, H = inputs_embeds.shape
    x = inputs_embeds + params["pos_emb"][None, :S] + params["type_emb"][token_type_ids]
    x = layernorm(x, params["ln0_g"], params["ln0_b"])

    # Fused Q/K/V projection: one (B*S, H) @ (H, 3H) Pallas matmul.
    x2 = x.reshape(B * S, H)
    w_qkv = jnp.concatenate([params["Wq"], params["Wk"], params["Wv"]], axis=1)
    qkv = pallas_matmul(x2, w_qkv)                                  # (B*S, 3H) f32
    q = qkv[:, :H].reshape(B, S, H)
    k = qkv[:, H:2 * H].reshape(B, S, H)
    v = qkv[:, 2 * H:].reshape(B, S, H)

    # Attention contractions on the bf16 MXU path (f32 accumulation).
    scores = jnp.einsum("bsh,bth->bst",
                        q.astype(jnp.bfloat16), k.astype(jnp.bfloat16),
                        preferred_element_type=jnp.float32) / jnp.sqrt(jnp.float32(H))
    bias = jnp.where(attention_mask[:, None, :] > 0, 0.0, -1e9)
    attn = jax.nn.softmax(scores + bias, axis=-1)
    ctx = jnp.einsum("bst,bth->bsh",
                     attn.astype(jnp.bfloat16), v.astype(jnp.bfloat16),
                     preferred_element_type=jnp.float32)

    ctx = pallas_matmul(ctx.reshape(B * S, H), params["Wo"]).reshape(B, S, H)
    x = layernorm(x + ctx, params["ln1_g"], params["ln1_b"])

    h = jax.nn.gelu(pallas_matmul(x.reshape(B * S, H), params["W1"]))
    h = pallas_matmul(h, params["W2"]).reshape(B, S, H)
    x = layernorm(x + h, params["ln2_g"], params["ln2_b"])
    return x


# ----------------------------------------------------------------------------
# ETypePromptModel (Pallas version)
# ----------------------------------------------------------------------------
class ETypePromptModelPallas:
    COS_EPS = 1e-6

    def __init__(self, params, similarity):
        self.params = params
        self.similarity = similarity
        self.label2embed = params["label2embed"]          # (C, L, H)
        C, L, H = self.label2embed.shape
        self.num_classes, self.len_label = C, L
        self._K = L * H

        # Precompute padded bf16 class-embedding matrices once (no per-forward
        # reshape/transpose/normalize of the weights; lane-dense Cp).
        Cp = _round_up(C, 128)
        Kp = _round_up(self._K, 128)
        w_flat = self.label2embed.reshape(C, self._K)
        self._w_mm = jnp.pad(w_flat.astype(jnp.bfloat16),
                             ((0, Cp - C), (0, Kp - self._K)))
        wn = jnp.sqrt(jnp.sum(self.label2embed * self.label2embed, axis=1))   # (C, H)
        w_hat = self.label2embed / jnp.maximum(wn, self.COS_EPS ** 0.5)[:, None, :]
        self._w_cos = jnp.pad(w_hat.reshape(C, self._K).astype(jnp.bfloat16),
                              ((0, Cp - C), (0, Kp - self._K)))

    def masked_hidden(self, input_ids, attention_mask, token_type_ids, mlm_labels):
        # embeddings = self.mlm.embeddings.word_embeddings(input_ids)
        embeddings = self.params["word_emb"][input_ids]                # (B, S, H)
        hidden_states = synthetic_mlm(self.params, embeddings,
                                      attention_mask, token_type_ids)  # (B, S, H)
        # hidden_states[mlm_labels >= 0].view(B, len_label, -1)
        # (assumes exactly len_label masked positions per example, like PyTorch)
        # gather the first len_label masked positions per example via cumsum rank
        B, S, _ = hidden_states.shape
        L = self.len_label
        mask = mlm_labels >= 0                                          # (B, S)
        rank = jnp.cumsum(mask.astype(jnp.int32), axis=1) - 1           # (B, S)
        onehot = (rank[:, :, None] == jnp.arange(L)[None, None, :]) & mask[:, :, None]
        idx = jnp.sum(onehot.astype(jnp.int32)
                      * jnp.arange(S, dtype=jnp.int32)[None, :, None], axis=1)  # (B, L)
        batch_hidden = jnp.take_along_axis(hidden_states, idx[:, :, None], axis=1)
        return batch_hidden                                             # (B, L, H)

    def forward(self, input_ids, attention_mask, token_type_ids, mlm_labels, labels):
        del labels  # unused in forward (kept for signature parity)
        batch_hidden = self.masked_hidden(input_ids, attention_mask,
                                          token_type_ids, mlm_labels)
        B = batch_hidden.shape[0]
        if self.similarity == "mm":
            x = batch_hidden.reshape(B, self._K)
            return similarity_matmul_pallas(x, self._w_mm, self.num_classes)
        elif self.similarity == "cos":
            # normalize once on the VPU, then reuse the MXU similarity matmul
            xn = jnp.sqrt(jnp.sum(batch_hidden * batch_hidden, axis=1))   # (B, H)
            x_hat = batch_hidden / jnp.maximum(xn, self.COS_EPS ** 0.5)[:, None, :]
            return similarity_matmul_pallas(x_hat.reshape(B, self._K),
                                            self._w_cos, self.num_classes)
        else:
            raise ValueError("unknown similiarty")


# ----------------------------------------------------------------------------
# References for the similarity hot path
# ----------------------------------------------------------------------------
def mm_ref(batch_hidden, label2embed):
    return jnp.einsum("blh,clh->bc", batch_hidden, label2embed,
                      precision=lax.Precision.HIGHEST)


def cos_ref(batch_hidden, label2embed, eps=1e-6):
    numer = jnp.einsum("blh,clh->bch", batch_hidden, label2embed,
                       precision=lax.Precision.HIGHEST)
    xn = jnp.sqrt(jnp.sum(batch_hidden * batch_hidden, axis=1))   # (B, H)
    wn = jnp.sqrt(jnp.sum(label2embed * label2embed, axis=1))     # (C, H)
    denom = jnp.maximum(xn[:, None, :] * wn[None, :, :], eps)
    return jnp.sum(numer / denom, axis=-1)


def mm_ref_bf16path(batch_hidden, label2embed):
    B, L, H = batch_hidden.shape
    C = label2embed.shape[0]
    x = batch_hidden.reshape(B, L * H).astype(jnp.bfloat16).astype(jnp.float32)
    w = label2embed.reshape(C, L * H).astype(jnp.bfloat16).astype(jnp.float32)
    return x @ w.T


def cos_ref_bf16path(batch_hidden, label2embed, eps=1e-6):
    B, L, H = batch_hidden.shape
    C = label2embed.shape[0]
    xn = jnp.sqrt(jnp.sum(batch_hidden * batch_hidden, axis=1))
    wn = jnp.sqrt(jnp.sum(label2embed * label2embed, axis=1))
    x_hat = batch_hidden / jnp.maximum(xn, eps ** 0.5)[:, None, :]
    w_hat = label2embed / jnp.maximum(wn, eps ** 0.5)[:, None, :]
    x2 = x_hat.reshape(B, L * H).astype(jnp.bfloat16).astype(jnp.float32)
    w2 = w_hat.reshape(C, L * H).astype(jnp.bfloat16).astype(jnp.float32)
    return x2 @ w2.T


# ----------------------------------------------------------------------------
# Main
# ----------------------------------------------------------------------------
def make_params(key, vocab, seq, hidden, ffn, num_classes, len_label):
    ks = jax.random.split(key, 12)
    scale = 0.05
    return {
        "word_emb": scale * jax.random.normal(ks[0], (vocab, hidden), jnp.float32),
        "pos_emb": scale * jax.random.normal(ks[1], (seq, hidden), jnp.float32),
        "type_emb": scale * jax.random.normal(ks[2], (2, hidden), jnp.float32),
        "Wq": scale * jax.random.normal(ks[3], (hidden, hidden), jnp.float32),
        "Wk": scale * jax.random.normal(ks[4], (hidden, hidden), jnp.float32),
        "Wv": scale * jax.random.normal(ks[5], (hidden, hidden), jnp.float32),
        "Wo": scale * jax.random.normal(ks[6], (hidden, hidden), jnp.float32),
        "W1": scale * jax.random.normal(ks[7], (hidden, ffn), jnp.float32),
        "W2": scale * jax.random.normal(ks[8], (ffn, hidden), jnp.float32),
        "label2embed": scale * jax.random.normal(
            ks[9], (num_classes, len_label, hidden), jnp.float32),
        "ln0_g": jnp.ones((hidden,), jnp.float32),
        "ln0_b": jnp.zeros((hidden,), jnp.float32),
        "ln1_g": jnp.ones((hidden,), jnp.float32),
        "ln1_b": jnp.zeros((hidden,), jnp.float32),
        "ln2_g": jnp.ones((hidden,), jnp.float32),
        "ln2_b": jnp.zeros((hidden,), jnp.float32),
    }


if __name__ == "__main__":
    B, S, H, V, FFN = 2, 8, 32, 64, 64
    C, L = 4, 2  # num_classes, len_label

    key = jax.random.PRNGKey(0)
    k_param, k_ids, k_lab = jax.random.split(key, 3)
    params = make_params(k_param, V, S, H, FFN, C, L)

    input_ids = jax.random.randint(k_ids, (B, S), 0, V, dtype=jnp.int32)
    attention_mask = jnp.ones((B, S), jnp.int32)
    token_type_ids = jnp.zeros((B, S), jnp.int32)
    labels = jax.random.randint(k_lab, (B,), 0, C, dtype=jnp.int32)

    # exactly len_label mask positions (>= 0) per example
    mlm_labels = jnp.full((B, S), -100, jnp.int32)
    mlm_labels = mlm_labels.at[0, 2].set(1).at[0, 3].set(1)
    mlm_labels = mlm_labels.at[1, 4].set(2).at[1, 5].set(2)

    for sim in ("mm", "cos"):
        model = ETypePromptModelPallas(params, similarity=sim)
        logits = model.forward(input_ids, attention_mask, token_type_ids,
                               mlm_labels, labels)
        logits = jax.block_until_ready(logits)
        assert logits.shape == (B, C), logits.shape

        batch_hidden = jax.block_until_ready(
            model.masked_hidden(input_ids, attention_mask, token_type_ids, mlm_labels))

        if sim == "mm":
            tight = mm_ref_bf16path(batch_hidden, params["label2embed"])
            loose = mm_ref(batch_hidden, params["label2embed"])
        else:
            tight = cos_ref_bf16path(batch_hidden, params["label2embed"])
            loose = cos_ref(batch_hidden, params["label2embed"])
        # structural check vs a reference following the same bf16-rounding path
        assert jnp.allclose(logits, tight, rtol=1e-3, atol=1e-3), (sim, logits, tight)
        # faithful f32 reference (bf16 MXU path => looser tolerance)
        assert jnp.allclose(logits, loose, rtol=2e-2, atol=5e-2), (sim, logits, loose)

    print("KERNEL_OK")
</pallas_src>

<mosaic_0001>
module attributes {stable_mosaic.version = 11 : i64} {
  func.func @_matmul_kernel(%arg0: i32, %arg1: i32, %arg2: i32, %arg3: memref<16x128xbf16, #tpu.memory_space<vmem>>, %arg4: memref<128x128xbf16, #tpu.memory_space<vmem>>, %arg5: memref<16x128xf32, #tpu.memory_space<vmem>>, %arg6: memref<16x128xf32, #tpu.memory_space<vmem>>) attributes {dimension_semantics = [#tpu.dimension_semantics<parallel>, #tpu.dimension_semantics<parallel>, #tpu.dimension_semantics<arbitrary>], iteration_bounds = array<i64: 1, 1, 1>, scalar_prefetch = 0 : i64, scratch_operands = 1 : i64, tpu.core_type = #tpu.core_type<tc>, window_params = [{transform_indices = @transform_0, window_bounds = array<i64: 16, 128>}, {transform_indices = @transform_1, window_bounds = array<i64: 128, 128>}, {transform_indices = @transform_2, window_bounds = array<i64: 16, 128>}]} {
    %c0_i32 = arith.constant 0 : i32
    %0 = arith.cmpi eq, %arg2, %c0_i32 : i32
    %1 = arith.extui %0 : i1 to i32
    %c0_i32_0 = arith.constant 0 : i32
    %2 = arith.cmpi ne, %1, %c0_i32_0 : i32
    scf.if %2 {
      %cst_10 = arith.constant 0.000000e+00 : f32
      %12 = vector.broadcast %cst_10 : f32 to vector<16x128xf32>
      %c0_11 = arith.constant 0 : index
      %c0_12 = arith.constant 0 : index
      %13 = vector.load %arg6[%c0_11, %c0_12] : memref<16x128xf32, #tpu.memory_space<vmem>>, vector<16x128xf32>
      tpu.vector_store %arg6[%c0_11, %c0_12], %12 {strides = array<i32>} : memref<16x128xf32, #tpu.memory_space<vmem>>, vector<16x128xf32>,
    } else {
    }
    %c0 = arith.constant 0 : index
    %c0_1 = arith.constant 0 : index
    %3 = vector.load %arg6[%c0, %c0_1] : memref<16x128xf32, #tpu.memory_space<vmem>>, vector<16x128xf32>
    %c0_2 = arith.constant 0 : index
    %c0_3 = arith.constant 0 : index
    %4 = vector.load %arg3[%c0_2, %c0_3] : memref<16x128xbf16, #tpu.memory_space<vmem>>, vector<16x128xbf16>
    %c0_4 = arith.constant 0 : index
    %c0_5 = arith.constant 0 : index
    %5 = vector.load %arg4[%c0_4, %c0_5] : memref<128x128xbf16, #tpu.memory_space<vmem>>, vector<128x128xbf16>
    %cst = arith.constant dense<0.000000e+00> : vector<16x128xf32>
    %6 = tpu.matmul %4, %5, %cst {dimension_numbers = #tpu.dot_dimension_numbers<[1], [0], [0], [1], [0, 0, 1, 1], [], []>} : vector<16x128xbf16>, vector<128x128xbf16>, vector<16x128xf32> -> vector<16x128xf32>
    %7 = arith.addf %3, %6 : vector<16x128xf32>
    %c0_6 = arith.constant 0 : index
    %c0_7 = arith.constant 0 : index
    %8 = vector.load %arg6[%c0_6, %c0_7] : memref<16x128xf32, #tpu.memory_space<vmem>>, vector<16x128xf32>
    tpu.vector_store %arg6[%c0_6, %c0_7], %7 {strides = array<i32>} : memref<16x128xf32, #tpu.memory_space<vmem>>, vector<16x128xf32>,
    %c0_i32_8 = arith.constant 0 : i32
    %9 = arith.cmpi eq, %arg2, %c0_i32_8 : i32
    %10 = arith.extui %9 : i1 to i32
    %c0_i32_9 = arith.constant 0 : i32
    %11 = arith.cmpi ne, %10, %c0_i32_9 : i32
    scf.if %11 {
      %c0_10 = arith.constant 0 : index
      %c0_11 = arith.constant 0 : index
      %12 = vector.load %arg6[%c0_10, %c0_11] : memref<16x128xf32, #tpu.memory_space<vmem>>, vector<16x128xf32>
      %c0_12 = arith.constant 0 : index
      %c0_13 = arith.constant 0 : index
      %13 = vector.load %arg5[%c0_12, %c0_13] : memref<16x128xf32, #tpu.memory_space<vmem>>, vector<16x128xf32>
      tpu.vector_store %arg5[%c0_12, %c0_13], %12 {strides = array<i32>} : memref<16x128xf32, #tpu.memory_space<vmem>>, vector<16x128xf32>,
    } else {
    }
    return
  }
  func.func @transform_0(%arg0: i32, %arg1: i32, %arg2: i32) -> (i32, i32) {
    %c0_i32 = arith.constant 0 : i32
    return %arg0, %arg2 : i32, i32
  }
  func.func @transform_1(%arg0: i32, %arg1: i32, %arg2: i32) -> (i32, i32) {
    %c0_i32 = arith.constant 0 : i32
    return %arg2, %arg1 : i32, i32
  }
  func.func @transform_2(%arg0: i32, %arg1: i32, %arg2: i32) -> (i32, i32) {
    %c0_i32 = arith.constant 0 : i32
    return %arg0, %arg1 : i32, i32
  }
}

</mosaic_0001>

<bundles_post_ra>
// kernel: tpu_custom_call.1
= control target key start
LH: loop header
LB: loop body
LE: loop exit
PB: predicated region body
PF: predicated region fallthrough
CT: control target
= control target key end

     0   :  { %7 = vsyncpa [#allocation4], 0  ;;  %s346_s0 = inlined_call_operand.hbm [shape: bf16[16,128], index: 0, kind: input, shape index: {}]   ;;  %s347_s1 = inlined_call_operand.hbm [shape: bf16[128,128], index: 1, kind: input, shape index: {}]   ;;  %s348_s2 = inlined_call_operand.hbm [shape: f32[16,128], index: 2, kind: output, shape index: {}]  }
   0x1   :  { %8 = vsyncpa [#allocation7], 0 }
   0x2   :  { %9 = vsyncpa [#allocation5], 0  ;;  %s313_s9 = smov [#allocation3]  }
   0x3   :  { %s15_s10 = sshll.u32 %s313_s9, 4  ;;  %s16_s10 = int_to_ptr.vmem [resolvable:$true] %s15_s10 }
   0x4   :  { %s255_s11 = scalar_lea.vmem %s16_s10, 128  ;;  %p260_p1 = scmp.lt.s32.totalorder %s16_s10, %s16_s10 }
   0x5   :  { %p256_p0 = scmp.ne.s32.totalorder %s16_s10, %s255_s11  ;;  %p261_p2 = scmp.lt.s32.totalorder %s255_s11, %s255_s11 }
   0x7   :  { %p262_p3 = por %p261_p2, %p260_p1 }
   0x9   :  { %p263_p4 = pnand %p262_p3, %p256_p0 }
   0xb   :  { %266 = shalt.err (!%p263_p4)
}
   0xc   :  { %s314_s12 = smov 64   ;;  %s315_s13 = smov 4  }
   0xd   :  { %21 = dma.hbm_to_vmem [thread:$0]  %s346_s0, 128, %s16_s10, [#allocation4], %s314_s12, %s314_s12, %s315_s13  }
   0xe   :  { %s316_s16 = smov [#allocation6]  }
   0xf   :  { %s27_s17 = sshll.u32 %s316_s16, 4  ;;  %s28_s17 = int_to_ptr.vmem [resolvable:$true] %s27_s17 }
  0x10   :  { %s275_s18 = scalar_lea.vmem %s28_s17, 1024  ;;  %p280_p6 = scmp.lt.s32.totalorder %s28_s17, %s28_s17 }
  0x11   :  { %p276_p5 = scmp.ne.s32.totalorder %s28_s17, %s275_s18  ;;  %p281_p7 = scmp.lt.s32.totalorder %s275_s18, %s275_s18 }
  0x13   :  { %p282_p8 = por %p281_p7, %p280_p6 }
  0x15   :  { %p283_p9 = pnand %p282_p8, %p276_p5 }
  0x17   :  { %286 = shalt.err (!%p283_p9)
}
  0x18   :  { %33 = dma.hbm_to_vmem [thread:$0]  %s347_s1, 1024, %s28_s17, [#allocation7], %s314_s12, %s314_s12, %s315_s13  }
  0x19   :  { %307 = dma.done.wait [#allocation4], 128  }
  0x1a   :  { %308 = vsyncadd [#allocation4], 4294967168 }
  0x1b   :  { %309 = dma.done.wait [#allocation7], 1024  }
  0x1c   :  { %310 = vsyncadd [#allocation7], 4294966272  ;;  %v317_v0 = vmov 0.0   ;;  %vm318_vm0 = vmmov 0   ;;  %v238_v1 = vld [vmem:[#allocation6 + $0x38] sm:$0xff]   ;;  %v239_v2 = vld [vmem:[#allocation6 + $0x30] sm:$0xff]  }
  0x1d   :  { %209 = vmatprep.subr.bf16.mxu0 %v317_v0  ;;  %225 = vmatprep.mubr.msk.bf16.mxu0 %vm318_vm0, %v317_v0  ;;  %v240_v3 = vld [vmem:[#allocation6 + $0x28] sm:$0xff]   ;;  %v241_v4 = vld [vmem:[#allocation6 + $0x20] sm:$0xff]   ;;  %v242_v5 = vld [vmem:[#allocation6 + $0x18] sm:$0xff]   ;;  %s319_s0 = smov [#allocation8]  }
  0x1e   :  { %210 = vmatpush3.bf16.msra.mxu0 %v238_v1  ;;  %v243_v6 = vld [vmem:[#allocation6 + $0x10] sm:$0xff]   ;;  %v244_v7 = vld [vmem:[#allocation6 + $0x8] sm:$0xff]   ;;  %v245_v8 = vld [vmem:[#allocation6] sm:$0xff]   ;;  %s178_s1 = sshll.u32 %s319_s0, 4  ;;  %s179_s1 = int_to_ptr.vmem [resolvable:$true] %s178_s1 }
  0x1f   :  { %211 = vmatprep.subr.bf16.mxu0 %v317_v0  ;;  %v246_v9 = vld [vmem:[#allocation3] sm:$0xff]   ;;  %s287_s21 = scalar_lea.vmem %s179_s1, 256  ;;  %p292_p11 = scmp.lt.s32.totalorder %s179_s1, %s179_s1 }
  0x20   :  { %p288_p10 = scmp.ne.s32.totalorder %s179_s1, %s287_s21  ;;  %p293_p12 = scmp.lt.s32.totalorder %s287_s21, %s287_s21 }
  0x22   :  { %212 = vmatpush3.bf16.msra.mxu0 %v239_v2  ;;  %p294_p13 = por %p293_p12, %p292_p11 }
  0x23   :  { %213 = vmatprep.subr.bf16.mxu0 %v317_v0 }
  0x24   :  { %p295_p0 = pnand %p294_p13, %p288_p10 }
  0x26   :  { %214 = vmatpush3.bf16.msra.mxu0 %v240_v3 }
  0x27   :  { %215 = vmatprep.subr.bf16.mxu0 %v317_v0 }
  0x2a   :  { %216 = vmatpush3.bf16.msra.mxu0 %v241_v4 }
  0x2b   :  { %217 = vmatprep.subr.bf16.mxu0 %v317_v0 }
  0x2e   :  { %218 = vmatpush3.bf16.msra.mxu0 %v242_v5 }
  0x2f   :  { %219 = vmatprep.subr.bf16.mxu0 %v317_v0 }
  0x32   :  { %220 = vmatpush3.bf16.msra.mxu0 %v243_v6 }
  0x33   :  { %221 = vmatprep.subr.bf16.mxu0 %v317_v0 }
  0x36   :  { %222 = vmatpush3.bf16.msra.mxu0 %v244_v7 }
  0x37   :  { %223 = vmatprep.subr.bf16.mxu0 %v317_v0 }
  0x3a   :  { %224 = vmatpush3.bf16.msra.mxu0 %v245_v8 }
  0x3d   :  { %226 = vmatmul.mubr.bf16.vlgmr.msra.gmra.mxu0 %v246_v9 }
  0xfd   :  { %v155_v10 = vpop.f32.mrf.mxu0 }
  0xfe   :  { %171 = vst [vmem:[#allocation8] sm:$0xff] %v155_v10 }
  0xff   :  { %v227_v11 = vpop.f32.mrf.mxu0 }
 0x101   :  { %v158_v12 = vpop.f32.mrf.mxu0 }
 0x102   :  { %172 = vst [vmem:[#allocation8 + $0x8] sm:$0xff] %v158_v12 }
 0x103   :  { %v228_v13 = vpop.f32.mrf.mxu0 }
 0x104   :  { %298 = shalt.err (!%p295_p0)
}
 0x105   :  { %s320_s22 = smov 128   ;;  %s321_s23 = smov 8  }
 0x106   :  { %184 = dma.vmem_to_hbm [thread:$0]  %s179_s1, 256, %s348_s2, [#allocation5], %s320_s22, %s320_s22, %s321_s23  }
 0x107   :  { %311 = dma.done.wait [#allocation5], 256  }
 0x108   :  { %312 = vsyncadd [#allocation5], 4294967040 }
 0x109   :  { %188 = vsyncpa [#allocation4], 1 }
 0x10a   :  { %189 = vsyncpa [#allocation7], 1 }
 0x10b   :  { %190 = vsyncpa [#allocation5], 1 }

</bundles_post_ra>
